<compile_context>
chip_gen: v7x
topology: tpu7x:2x2x1
jax: 0.10.0
libtpu: 0.0.40
codegen_flags: <defaults>
</compile_context>

<pallas_src>
import functools
import math

import jax
import jax.numpy as jnp
from jax import lax
from jax.experimental import pallas as pl
from jax.experimental.pallas import tpu as pltpu

EPS = 1e-5
_INV_SQRT2 = 1.0 / math.sqrt(2.0)


def _gelu_exact(x):
    # F.gelu default: 0.5 * x * (1 + erf(x / sqrt(2)))
    return 0.5 * x * (1.0 + lax.erf(x * _INV_SQRT2))


def _dense_resnet_kernel(x_ref, w_ref, gb_ref, o_ref, *, inv_n, fn, aligned):
    # x_ref : (N, K)      full batch, full contraction (resident across tiles)
    # w_ref : (K, 2*fn)   [w1 tile | w_skip tile] for this feature tile
    # gb_ref: (2, 2*fn)   row 0 = gamma, row 1 = beta (same column layout as w_ref)
    # o_ref : (N, fn) if aligned (answer columns only)
    #         (N, 2*fn) otherwise (lanes [0, fn) = answer, rest don't-care)
    x = x_ref[...]

    # One fused MXU pass for both branches. Linear biases omitted: they are
    # exactly cancelled by the train-mode BatchNorm mean subtraction.
    y = jnp.dot(x, w_ref[...], preferred_element_type=jnp.float32)   # (N, 2*fn)

    # Fused train-mode BatchNorm (per-column stats over the batch axis):
    # single pass for sums, then a single per-element FMA.
    s1 = jnp.sum(y, axis=0, keepdims=True)
    s2 = jnp.sum(y * y, axis=0, keepdims=True)
    mean = s1 * inv_n
    var = jnp.maximum(s2 * inv_n - mean * mean, 0.0)   # guard tiny negative (fp round)
    scale = gb_ref[0:1, :] * lax.rsqrt(var + EPS)      # rsqrt -> EUP slot
    shift = gb_ref[1:2, :] - mean * scale
    yn = y * scale + shift                             # [ bn1(main) | bn_skip(skip) ]

    if aligned:
        # fn % 128 == 0: halves are whole-vreg lane slices. GELU only where the
        # module applies it (main branch + final sum); store only answer lanes.
        main = yn[:, :fn]
        skip = yn[:, fn:]
        o_ref[...] = _gelu_exact(_gelu_exact(main) + skip).astype(o_ref.dtype)
    else:
        # F < 128 fallback: keep the lane-dense 2*fn tile; swap halves on the
        # XLU so the answer lands in lanes [0, fn); wrapper slices it out.
        g = _gelu_exact(yn)                                # [ gelu(main) | junk ]
        sw = pltpu.roll(yn, shift=fn, axis=1)              # [ skip | main ] (axis >= 0!)
        o_ref[...] = _gelu_exact(g + sw).astype(o_ref.dtype)


def _block_pair(a, b, fn):
    """Interleave feature blocks of a and b along the last axis:
    out[..., j*2*fn      : j*2*fn + fn ] = a[..., j*fn:(j+1)*fn]
    out[..., j*2*fn + fn : (j+1)*2*fn  ] = b[..., j*fn:(j+1)*fn]
    """
    *lead, f = a.shape
    nb = f // fn
    a = a.reshape(*lead, nb, fn)
    b = b.reshape(*lead, nb, fn)
    return jnp.concatenate([a, b], axis=-1).reshape(*lead, nb * 2 * fn)


def _auto_feature_block(f):
    # Aligned sizes: fn = 128 -> fused RHS width 256 (fills v6e/v7x MXU) and
    # nb = f/128 >= 2 when f >= 256 (lets v7x's two TCs split the grid).
    if f % 128 == 0 and f >= 256:
        return 128
    return f


def dense_resnet_layer(x, params, *, feature_block=None):
    """x: (N, in_features) f32. Returns (N, out_features) f32.
    Implements the identity_process=True path (in_features != out_features)."""
    n, k = x.shape
    f = params["w1"].shape[1]
    fn = _auto_feature_block(f) if feature_block is None else feature_block
    assert f % fn == 0
    nb = f // fn
    aligned = (fn % 128 == 0)
    if not aligned:
        # Unaligned tiles must be the whole array (BlockSpec (8,128) rule).
        assert nb == 1, "unaligned feature_block requires a single feature tile"
    f2 = 2 * fn                      # fused (main|skip) tile width

    # Pack operands: one weight slab and one (2, nb*2*fn) gamma/beta slab.
    w_cat = _block_pair(params["w1"], params["ws"], fn)          # (K, nb*2*fn)
    gamma = _block_pair(params["g1"], params["gs"], fn)          # (nb*2*fn,)
    beta = _block_pair(params["be1"], params["bes"], fn)         # (nb*2*fn,)
    gb = jnp.stack([gamma, beta], axis=0)                        # (2, nb*2*fn)

    kernel = functools.partial(
        _dense_resnet_kernel, inv_n=1.0 / n, fn=fn, aligned=aligned)

    out_w = fn if aligned else f2
    # VMEM budget: resident x + double-buffered (w, gb, out) tiles + live f32
    # intermediates (~6 copies of the (N, 2*fn) slab). Cap at 64 MiB (v7x-safe).
    est_bytes = 4 * (2 * n * k + 2 * (k * f2 + 2 * f2 + n * out_w) + 6 * n * f2)
    vmem_limit = int(min(max(2 * est_bytes, 32 << 20), 64 << 20))

    compiler_params = pltpu.CompilerParams(
        dimension_semantics=("parallel",),     # feature tiles are independent
        vmem_limit_bytes=vmem_limit,
    )

    in_specs = [
        pl.BlockSpec((n, k), lambda j: (0, 0)),      # x resident across tiles
        pl.BlockSpec((k, f2), lambda j: (0, j)),     # fused weight tile
        pl.BlockSpec((2, f2), lambda j: (0, j)),     # gamma/beta tile
    ]

    if aligned:
        # Answer columns only: lane-dense unmasked store, no wrapper slice pass.
        return pl.pallas_call(
            kernel,
            out_shape=jax.ShapeDtypeStruct((n, f), jnp.float32),
            grid=(nb,),
            in_specs=in_specs,
            out_specs=pl.BlockSpec((n, fn), lambda j: (0, j)),
            compiler_params=compiler_params,
        )(x, w_cat, gb)

    # Unaligned fallback: store the full lane-dense fused tile, slice in wrapper.
    out_full = pl.pallas_call(
        kernel,
        out_shape=jax.ShapeDtypeStruct((n, nb * f2), jnp.float32),
        grid=(nb,),
        in_specs=in_specs,
        out_specs=pl.BlockSpec((n, f2), lambda j: (0, j)),
        compiler_params=compiler_params,
    )(x, w_cat, gb)
    return out_full.reshape(n, nb, f2)[:, :, :fn].reshape(n, f)


def make_params(key, in_features, out_features):
    k1, k2, k3, k4 = jax.random.split(key, 4)
    bound = 1.0 / math.sqrt(in_features)
    # nn.Linear-style init; weights stored pre-transposed as (in, out).
    w1 = jax.random.uniform(k1, (in_features, out_features), jnp.float32, -bound, bound)
    b1 = jax.random.uniform(k2, (out_features,), jnp.float32, -bound, bound)
    ws = jax.random.uniform(k3, (in_features, out_features), jnp.float32, -bound, bound)
    bs = jax.random.uniform(k4, (out_features,), jnp.float32, -bound, bound)
    # BatchNorm1d defaults: gamma=1, beta=0
    g1 = jnp.ones((out_features,), jnp.float32)
    be1 = jnp.zeros((out_features,), jnp.float32)
    gs = jnp.ones((out_features,), jnp.float32)
    bes = jnp.zeros((out_features,), jnp.float32)
    return dict(w1=w1, b1=b1, g1=g1, be1=be1, ws=ws, bs=bs, gs=gs, bes=bes)


def _bn_train_ref(y, gamma, beta):
    mean = jnp.mean(y, axis=0, keepdims=True)
    var = jnp.mean((y - mean) ** 2, axis=0, keepdims=True)
    return (y - mean) * lax.rsqrt(var + EPS) * gamma + beta


def reference(x, p):
    # Faithful two-pass-BN / biased reference (biases kept here on purpose; the
    # kernel drops them because train-mode BN cancels them exactly).
    out = x @ p["w1"] + p["b1"]
    out = _bn_train_ref(out, p["g1"], p["be1"])
    out = _gelu_exact(out)
    skip = x @ p["ws"] + p["bs"]
    skip = _bn_train_ref(skip, p["gs"], p["bes"])
    return _gelu_exact(out + skip)


if __name__ == "__main__":
    key = jax.random.PRNGKey(0)
    kx1, kp1, kx2, kp2 = jax.random.split(key, 4)

    # 1) Small / unaligned path (out_features < 128): roll-trick fallback.
    batch, in_features, out_features = 8, 32, 64
    x = jax.random.normal(kx1, (batch, in_features), jnp.float32)
    params = make_params(kp1, in_features, out_features)
    out = jax.block_until_ready(dense_resnet_layer(x, params))
    ref = reference(x, params)
    assert out.shape == (batch, out_features)
    assert jnp.allclose(out, ref, rtol=1e-4, atol=1e-4), "mismatch (unaligned path)"

    # 2) Lane-aligned path (out_features % 128 == 0): fn=128, fused RHS 256 wide,
    #    nb=2 feature tiles, answer-only store, GELU on main half only.
    batch2, in2, out2 = 16, 32, 256
    x2 = jax.random.normal(kx2, (batch2, in2), jnp.float32)
    params2 = make_params(kp2, in2, out2)
    out_b = jax.block_until_ready(dense_resnet_layer(x2, params2))
    ref_b = reference(x2, params2)
    assert out_b.shape == (batch2, out2)
    assert jnp.allclose(out_b, ref_b, rtol=1e-4, atol=1e-4), "mismatch (aligned path)"

    print("KERNEL_OK")
</pallas_src>

<mosaic_0001>
module attributes {stable_mosaic.version = 11 : i64} {
  func.func @_dense_resnet_kernel(%arg0: i32, %arg1: memref<8x32xf32, #tpu.memory_space<vmem>>, %arg2: memref<32x128xf32, #tpu.memory_space<vmem>>, %arg3: memref<2x128xf32, #tpu.memory_space<vmem>>, %arg4: memref<8x128xf32, #tpu.memory_space<vmem>>) attributes {dimension_semantics = [#tpu.dimension_semantics<parallel>], iteration_bounds = array<i64: 1>, scalar_prefetch = 0 : i64, scratch_operands = 0 : i64, tpu.core_type = #tpu.core_type<tc>, window_params = [{pipeline_mode = #tpu.pipeline_mode<synchronous>, transform_indices = @transform_0, window_bounds = array<i64: 8, 32>}, {transform_indices = @transform_1, window_bounds = array<i64: 32, 128>}, {transform_indices = @transform_2, window_bounds = array<i64: 2, 128>}, {transform_indices = @transform_3, window_bounds = array<i64: 8, 128>}]} {
    %c0 = arith.constant 0 : index
    %c0_0 = arith.constant 0 : index
    %0 = vector.load %arg1[%c0, %c0_0] : memref<8x32xf32, #tpu.memory_space<vmem>>, vector<8x32xf32>
    %c0_1 = arith.constant 0 : index
    %c0_2 = arith.constant 0 : index
    %1 = vector.load %arg2[%c0_1, %c0_2] : memref<32x128xf32, #tpu.memory_space<vmem>>, vector<32x128xf32>
    %cst = arith.constant dense<0.000000e+00> : vector<8x128xf32>
    %2 = tpu.matmul %0, %1, %cst {dimension_numbers = #tpu.dot_dimension_numbers<[1], [0], [0], [1], [0, 0, 1, 1], [], []>} : vector<8x32xf32>, vector<32x128xf32>, vector<8x128xf32> -> vector<8x128xf32>
    %cst_3 = arith.constant dense<0.000000e+00> : vector<128xf32>
    %3 = vector.multi_reduction <add>, %2, %cst_3 [0] : vector<8x128xf32> to vector<128xf32>
    %4 = vector.shape_cast %3 : vector<128xf32> to vector<1x128xf32>
    %5 = arith.mulf %2, %2 : vector<8x128xf32>
    %cst_4 = arith.constant dense<0.000000e+00> : vector<128xf32>
    %6 = vector.multi_reduction <add>, %5, %cst_4 [0] : vector<8x128xf32> to vector<128xf32>
    %7 = vector.shape_cast %6 : vector<128xf32> to vector<1x128xf32>
    %cst_5 = arith.constant 1.250000e-01 : f32
    %8 = vector.broadcast %cst_5 : f32 to vector<1x128xf32>
    %9 = arith.mulf %4, %8 : vector<1x128xf32>
    %cst_6 = arith.constant 1.250000e-01 : f32
    %10 = vector.broadcast %cst_6 : f32 to vector<1x128xf32>
    %11 = arith.mulf %7, %10 : vector<1x128xf32>
    %12 = arith.mulf %9, %9 : vector<1x128xf32>
    %13 = arith.subf %11, %12 : vector<1x128xf32>
    %cst_7 = arith.constant 0.000000e+00 : f32
    %14 = vector.broadcast %cst_7 : f32 to vector<1x128xf32>
    %15 = arith.maximumf %13, %14 : vector<1x128xf32>
    %c0_8 = arith.constant 0 : index
    %c0_9 = arith.constant 0 : index
    %16 = vector.load %arg3[%c0_8, %c0_9] : memref<2x128xf32, #tpu.memory_space<vmem>>, vector<1x128xf32>
    %cst_10 = arith.constant 9.99999974E-6 : f32
    %17 = vector.broadcast %cst_10 : f32 to vector<1x128xf32>
    %18 = arith.addf %15, %17 : vector<1x128xf32>
    %19 = math.rsqrt %18 : vector<1x128xf32>
    %20 = arith.mulf %16, %19 : vector<1x128xf32>
    %c1 = arith.constant 1 : index
    %c0_11 = arith.constant 0 : index
    %21 = vector.load %arg3[%c1, %c0_11] : memref<2x128xf32, #tpu.memory_space<vmem>>, vector<1x128xf32>
    %22 = arith.mulf %9, %20 : vector<1x128xf32>
    %23 = arith.subf %21, %22 : vector<1x128xf32>
    %24 = vector.broadcast %20 : vector<1x128xf32> to vector<8x128xf32>
    %25 = arith.mulf %2, %24 : vector<8x128xf32>
    %26 = vector.broadcast %23 : vector<1x128xf32> to vector<8x128xf32>
    %27 = arith.addf %25, %26 : vector<8x128xf32>
    %cst_12 = arith.constant 5.000000e-01 : f32
    %28 = vector.broadcast %cst_12 : f32 to vector<8x128xf32>
    %29 = arith.mulf %28, %27 : vector<8x128xf32>
    %cst_13 = arith.constant 0.707106769 : f32
    %30 = vector.broadcast %cst_13 : f32 to vector<8x128xf32>
    %31 = arith.mulf %27, %30 : vector<8x128xf32>
    %32 = math.erf %31 : vector<8x128xf32>
    %cst_14 = arith.constant 1.000000e+00 : f32
    %33 = vector.broadcast %cst_14 : f32 to vector<8x128xf32>
    %34 = arith.addf %33, %32 : vector<8x128xf32>
    %35 = arith.mulf %29, %34 : vector<8x128xf32>
    %c64_i32 = arith.constant 64 : i32
    %36 = tpu.dynamic_rotate %27 by %c64_i32 dim 1 : vector<8x128xf32>, i32 -> vector<8x128xf32>
    %37 = arith.addf %35, %36 : vector<8x128xf32>
    %cst_15 = arith.constant 5.000000e-01 : f32
    %38 = vector.broadcast %cst_15 : f32 to vector<8x128xf32>
    %39 = arith.mulf %38, %37 : vector<8x128xf32>
    %cst_16 = arith.constant 0.707106769 : f32
    %40 = vector.broadcast %cst_16 : f32 to vector<8x128xf32>
    %41 = arith.mulf %37, %40 : vector<8x128xf32>
    %42 = math.erf %41 : vector<8x128xf32>
    %cst_17 = arith.constant 1.000000e+00 : f32
    %43 = vector.broadcast %cst_17 : f32 to vector<8x128xf32>
    %44 = arith.addf %43, %42 : vector<8x128xf32>
    %45 = arith.mulf %39, %44 : vector<8x128xf32>
    %c0_18 = arith.constant 0 : index
    %c0_19 = arith.constant 0 : index
    %46 = vector.load %arg4[%c0_18, %c0_19] : memref<8x128xf32, #tpu.memory_space<vmem>>, vector<8x128xf32>
    tpu.vector_store %arg4[%c0_18, %c0_19], %45 {strides = array<i32>} : memref<8x128xf32, #tpu.memory_space<vmem>>, vector<8x128xf32>,
    return
  }
  func.func @transform_0(%arg0: i32) -> (i32, i32) {
    %c0_i32 = arith.constant 0 : i32
    %c0_i32_0 = arith.constant 0 : i32
    %c0_i32_1 = arith.constant 0 : i32
    return %c0_i32, %c0_i32_0 : i32, i32
  }
  func.func @transform_1(%arg0: i32) -> (i32, i32) {
    %c0_i32 = arith.constant 0 : i32
    %c0_i32_0 = arith.constant 0 : i32
    return %c0_i32, %arg0 : i32, i32
  }
  func.func @transform_2(%arg0: i32) -> (i32, i32) {
    %c0_i32 = arith.constant 0 : i32
    %c0_i32_0 = arith.constant 0 : i32
    return %c0_i32, %arg0 : i32, i32
  }
  func.func @transform_3(%arg0: i32) -> (i32, i32) {
    %c0_i32 = arith.constant 0 : i32
    %c0_i32_0 = arith.constant 0 : i32
    return %c0_i32, %arg0 : i32, i32
  }
}

</mosaic_0001>

<bundles_post_ra>
// kernel: tpu_custom_call.1
= control target key start
LH: loop header
LB: loop body
LE: loop exit
PB: predicated region body
PF: predicated region fallthrough
CT: control target
= control target key end

     0   :  { %8 = vsyncpa [#allocation3], 0  ;;  %s373_s0 = inlined_call_operand.hbm [shape: f32[8,32], index: 0, kind: input, shape index: {}]   ;;  %s374_s1 = inlined_call_operand.hbm [shape: f32[32,128], index: 1, kind: input, shape index: {}]   ;;  %s375_s2 = inlined_call_operand.vmem [shape: f32[2,128], index: 2, kind: input, shape index: {}]   ;;  %s376_s3 = inlined_call_operand.hbm [shape: f32[8,128], index: 3, kind: output, shape index: {}]  }
   0x1   :  { %9 = vsyncpa [#allocation6], 0 }
   0x2   :  { %10 = vsyncpa [#allocation4], 0  ;;  %s295_s12 = smov [#allocation2]   ;;  %s296_s14 = smov [#allocation5]  }
   0x3   :  { %s17_s13 = sshll.u32 %s295_s12, 4  ;;  %s26_s15 = sshll.u32 %s296_s14, 4  ;;  %s18_s13 = int_to_ptr.vmem [resolvable:$true] %s17_s13  ;;  %s324_s15 = int_to_ptr.vmem [resolvable:$true] %s26_s15 }
   0x4   :  { %s223_s18 = scalar_lea.hbm %s373_s0, 128 }
   0x5   :  { %p224_p0 = scmp.ne.s32.totalorder %s373_s0, %s223_s18  ;;  %p227_p1 = scmp.lt.u32.totalorder %s223_s18, %s373_s0 }
   0x7   :  { %p229_p2 = pnand %p227_p1, %p224_p0 }
   0x9   :  { %232 = shalt.err (!%p229_p2)
}
   0xa   :  { %s233_s23 = scalar_lea.vmem %s18_s13, 128  ;;  %p238_p4 = scmp.lt.s32.totalorder %s18_s13, %s18_s13 }
   0xb   :  { %p234_p3 = scmp.ne.s32.totalorder %s18_s13, %s233_s23  ;;  %p239_p5 = scmp.lt.s32.totalorder %s233_s23, %s233_s23 }
   0xd   :  { %p240_p6 = por %p239_p5, %p238_p4 }
   0xf   :  { %p241_p7 = pnand %p240_p6, %p234_p3 }
  0x11   :  { %244 = shalt.err (!%p241_p7)
}
  0x12   :  { %20 = dma.hbm_to_vmem [thread:$0]  %s373_s0, 128, %s18_s13, [#allocation3]  }
  0x13   :  { %s245_s28 = scalar_lea.hbm %s374_s1, 512 }
  0x14   :  { %p246_p8 = scmp.ne.s32.totalorder %s374_s1, %s245_s28  ;;  %p249_p9 = scmp.lt.u32.totalorder %s245_s28, %s374_s1 }
  0x16   :  { %p251_p10 = pnand %p249_p9, %p246_p8 }
  0x18   :  { %254 = shalt.err (!%p251_p10)
}
  0x19   :  { %s255_s6 = scalar_lea.vmem %s324_s15, 512  ;;  %p260_p12 = scmp.lt.s32.totalorder %s324_s15, %s324_s15 }
  0x1a   :  { %p256_p11 = scmp.ne.s32.totalorder %s324_s15, %s255_s6  ;;  %p261_p13 = scmp.lt.s32.totalorder %s255_s6, %s255_s6 }
  0x1c   :  { %p262_p0 = por %p261_p13, %p260_p12 }
  0x1e   :  { %p263_p1 = pnand %p262_p0, %p256_p11 }
  0x20   :  { %266 = shalt.err (!%p263_p1)
}
  0x21   :  { %s297_s0 = smov 128   ;;  %s298_s7 = smov 8  }
  0x22   :  { %32 = dma.hbm_to_vmem [thread:$0]  %s374_s1, 512, %s324_s15, [#allocation6], %s297_s0, %s297_s0, %s298_s7  }
  0x23   :  { %289 = dma.done.wait [#allocation3], 128  }
  0x24   :  { %290 = vsyncadd [#allocation3], 4294967168 }
  0x25   :  { %291 = dma.done.wait [#allocation6], 512  }
  0x26   :  { %292 = vsyncadd [#allocation6], 4294966784  ;;  %v299_v0 = vmov 0.0|0.0   ;;  %vm300_vm0 = vmmov 0   ;;  %v301_v1 = vmov 0.0   ;;  %v42_v2 = vld [vmem:[#allocation5] sm:$0xff]  ;;  %v145_v30 = vlaneseq }
  0x27   :  { %202 = vmatprep.subr.bf16.mxu0 %v299_v0  ;;  %199 = vmatprep.mubr.msk.f32.mxu0 %vm300_vm0, %v301_v1  ;;  %v43_v3 = vld [vmem:[#allocation5 + $0x8] sm:$0xff]  ;;  %v44_v4 = vld [vmem:[#allocation5 + $0x10] sm:$0xff]  ;;  %v45_v6 = vld [vmem:[#allocation5 + $0x18] sm:$0xff]  ;;  %vm46_vm1 = vcmask 261120   ;;  %s302_s13 = smov 64  }
  0x28   :  { %v203_v5 = vpack.c.bf16 %v43_v3, %v42_v2  ;;  %v206_v7 = vpack.c.bf16 %v45_v6, %v44_v4  ;;  %v41_v8 = vld [vmem:[#allocation2] sm:$0xff]  ;;  %v146_v31 = vshrl.u32 %v145_v30, 7 }
  0x29   :  { %v138_v32 = vld [vmem:[%s375_s2] sm:$0x1]  ;;  %v142_v36 = vld [vmem:[%s375_s2 + $0x1] sm:$0x1]  ;;  %s303_s2 = smov [#allocation7]  }
  0x2a   :  { %204 = vmatpush3.bf16.msra.mxu0 %v203_v5  ;;  %v147_v33 = vsub.s32 0, %v146_v31  ;;  %s175_s14 = sshll.u32 %s303_s2, 4  ;;  %s176_s14 = int_to_ptr.vmem [resolvable:$true] %s175_s14 }
  0x2b   :  { %205 = vmatprep.subr.bf16.mxu0 %v299_v0  ;;  %s267_s15 = scalar_lea.vmem %s176_s14, 128  ;;  %p272_p3 = scmp.lt.s32.totalorder %s176_s14, %s176_s14 }
  0x2c   :  { %p268_p2 = scmp.ne.s32.totalorder %s176_s14, %s267_s15  ;;  %p273_p4 = scmp.lt.s32.totalorder %s267_s15, %s267_s15 }
  0x2e   :  { %207 = vmatpush3.bf16.msra.mxu0 %v206_v7  ;;  %p274_p5 = por %p273_p4, %p272_p3 }
  0x30   :  { %p275_p6 = pnand %p274_p5, %p268_p2 }
  0x31   :  { %200 = vmatmul.mubr.msk.f32.vlgmr.msra.gmra.mrb[0].mxu0 %vm46_vm1, %v41_v8 }
 0x104   :  { %v116_v9 = vpop.f32.mrb[0].mxu0 }
 0x105   :  { %v120_v10 = vrot.slane %v116_v9, 4  ;;  %v126_v11 = vmul.f32 %v116_v9, %v116_v9  ;;  %v201_v12 = vpop.f32.mrb[1].mxu0 }
 0x107   :  { %v121_v13 = vadd.f32 %v120_v10, %v116_v9  ;;  %v127_v14 = vrot.slane %v126_v11, 4 }
 0x109   :  { %v122_v15 = vrot.slane %v121_v13, 2  ;;  %v128_v16 = vadd.f32 %v127_v14, %v126_v11 }
 0x10b   :  { %v123_v17 = vadd.f32 %v122_v15, %v121_v13  ;;  %v129_v18 = vrot.slane %v128_v16, 2 }
 0x10d   :  { %v124_v19 = vrot.slane %v123_v17, 1  ;;  %v130_v20 = vadd.f32 %v129_v18, %v128_v16 }
 0x10f   :  { %v125_v21 = vadd.f32 %v124_v19, %v123_v17  ;;  %v131_v22 = vrot.slane %v130_v20, 1 }
 0x111   :  { %v132_v23 = vadd.f32 %v131_v22, %v130_v20  ;;  %v133_v24 = vmul.f32 0.125, %v125_v21 }
 0x113   :  { %v134_v25 = vmul.f32 0.125, %v132_v23  ;;  %v135_v26 = vmul.f32 %v133_v24, %v133_v24 }
 0x115   :  { %v136_v27 = vsub.f32 %v134_v25, %v135_v26 }
 0x117   :  { %v137_v28 = vmax.f32 %v136_v27, 0.0 }
 0x119   :  { %v139_v29 = vadd.f32 1e-05, %v137_v28 }
 0x11b   :  { %217 = vrsqrt.f32 %v139_v29 }
 0x125   :  { %v218_v34 = vpop.eup %217 }
 0x126   :  { %v141_v35 = vmul.f32 %v218_v34, %v138_v32 }
 0x128   :  { %v148_v37 = vrot.slane %v141_v35, %v147_v33  ;;  %v143_v38 = vmul.f32 %v141_v35, %v133_v24 }
 0x12a   :  { %v144_v39 = vsub.f32 %v142_v36, %v143_v38  ;;  %v149_v40 = vmul.f32 %v148_v37, %v116_v9 }
 0x12c   :  { %v153_v41 = vrot.slane %v144_v39, %v147_v33 }
 0x12e   :  { %v154_v42 = vadd.f32 %v153_v41, %v149_v40 }
 0x130   :  { %160 = vrot.lane.b32.xlu0 %v154_v42, %s302_s13  ;;  %v156_v43 = vmul.f32 0.70710677, %v154_v42  ;;  %v155_v46 = vmul.f32 0.5, %v154_v42 }
 0x132   :  { %219 = verf.f32 %v156_v43 }
 0x13c   :  { %v220_v44 = vpop.eup %219 }
 0x13d   :  { %v158_v45 = vadd.f32 1.0, %v220_v44 }
 0x13f   :  { %v159_v47 = vmul.f32 %v158_v45, %v155_v46 }
 0x1a2   :  { %v161_v48 = vpop.permute.xlu0 %160 }
 0x1a3   :  { %v162_v49 = vadd.f32 %v161_v48, %v159_v47 }
 0x1a5   :  { %v164_v50 = vmul.f32 0.70710677, %v162_v49  ;;  %v163_v52 = vmul.f32 0.5, %v162_v49 }
 0x1a7   :  { %221 = verf.f32 %v164_v50 }
 0x1b1   :  { %v222_v51 = vpop.eup %221 }
 0x1b2   :  { %v166_v53 = vadd.f32 1.0, %v222_v51 }
 0x1b4   :  { %v167_v54 = vmul.f32 %v166_v53, %v163_v52 }
 0x1b6   :  { %168 = vst [vmem:[#allocation7] sm:$0xff] %v167_v54 }
 0x1b7   :  { %278 = shalt.err (!%p275_p6)
}
 0x1b8   :  { %s279_s18 = scalar_lea.hbm %s376_s3, 128 }
 0x1b9   :  { %p280_p7 = scmp.ne.s32.totalorder %s376_s3, %s279_s18  ;;  %p283_p8 = scmp.lt.u32.totalorder %s279_s18, %s376_s3 }
 0x1bb   :  { %p285_p9 = pnand %p283_p8, %p280_p7 }
 0x1bd   :  { %288 = shalt.err (!%p285_p9)
}
 0x1be   :  { %178 = dma.vmem_to_hbm [thread:$0]  %s176_s14, 128, %s376_s3, [#allocation4]  }
 0x1bf   :  { %293 = dma.done.wait [#allocation4], 128  }
 0x1c0   :  { %294 = vsyncadd [#allocation4], 4294967168 }
 0x1c1   :  { %182 = vsyncpa [#allocation3], 1 }
 0x1c2   :  { %183 = vsyncpa [#allocation6], 1 }
 0x1c3   :  { %184 = vsyncpa [#allocation4], 1 }

</bundles_post_ra>
